<compile_context>
chip_gen: v5e
topology: v5e:2x2
jax: 0.10.0
libtpu: 0.0.40
codegen_flags: <defaults>
</compile_context>

<pallas_src>
import jax
import jax.numpy as jnp
from jax.experimental import pallas as pl
from jax.experimental.pallas import tpu as pltpu


def _round_up(a: int, m: int) -> int:
    return -(-a // m) * m


def _latlon_add_kernel(x_ref, pe_ref, o_ref):
    # x_ref / o_ref: (TM, TN) tile of the lane-dense (S, S*D) view.
    # pe_ref: (1, TN) slice of the flattened pe row; constant row block index, so it stays
    # resident in VMEM.  The sublane broadcast folds into the single VPU add.
    o_ref[...] = x_ref[...] + pe_ref[...]


def make_pe(d_model: int, max_len: int = 1000) -> jnp.ndarray:
    """Deterministic buffer init mirroring the PyTorch __init__ (odd d_model safe)."""
    position = jnp.arange(max_len, dtype=jnp.float32)[:, None]               # (max_len, 1)
    div_term = jnp.exp(
        jnp.arange(0, d_model, 2, dtype=jnp.float32)
        * (-jnp.log(jnp.float32(10000.0)) / d_model)
    )                                                                        # (ceil(d/2),)
    sin = jnp.sin(position * div_term)
    cos = jnp.cos(position * div_term)
    pe = jnp.zeros((max_len, d_model), dtype=jnp.float32)
    pe = pe.at[:, 0::2].set(sin)
    pe = pe.at[:, 1::2].set(cos[:, : d_model // 2])   # odd d_model: drop extra cos column
    return pe


def _choose_tiles(S: int, N: int, itemsize: int, target_bytes: int = 4 << 20):
    """Pick (TM, TN) row/column tiles for the lane-dense (S, N) view.

    TM is a multiple of the dtype's sublane packing (8 f32 / 16 bf16 / 32 int8) or the full S;
    TN is a multiple of 128 lanes or the full N.  Tiles target ~4 MiB; when everything fits a
    single tile the rows are still split in two so v7x's second TensorCore is not idle.
    """
    row_mult = 8 * max(1, 4 // itemsize)

    # Column tile: full width unless even a minimal row group busts the budget.
    if N <= 128 or N * itemsize * row_mult <= target_bytes:
        TN = N
    else:
        tn = max(128, (target_bytes // (row_mult * itemsize)) // 128 * 128)
        TN = min(N, tn)

    # Row tile: as many sublane groups as fit the budget.
    tm_target = max(1, target_bytes // max(1, TN * itemsize))
    TM = min(S, max(row_mult, (tm_target // row_mult) * row_mult))

    # Megacore: guarantee >= 2 grid steps whenever S is big enough to split.
    if TM >= S and TN >= N and S >= 2 * row_mult:
        TM = min(S, _round_up(-(-S // 2), row_mult))
    return TM, TN


class LatLonEncoding:
    """Pallas/TPU port of the PyTorch latLonEncoding module."""

    # Below this, pallas_call fixed cost (launch + pipeline prologue) beats a fused XLA add.
    _FAST_PATH_BYTES = 1 << 20

    def __init__(self, d_model: int, max_len: int = 1000):
        self.d_model = d_model
        self.max_len = max_len
        self.pe = make_pe(d_model, max_len)          # (max_len, d_model) f32 buffer
        self._pe_row_cache = {}                      # (S, dtype) -> (1, S*d_model)

    def _pe_row(self, S: int, dtype) -> jnp.ndarray:
        key = (S, jnp.dtype(dtype).name)
        row = self._pe_row_cache.get(key)
        if row is None:
            # Hoisted out of the per-call path: slice + cast + lane-dense view, cached.
            row = self.pe[:S].astype(dtype).reshape(1, S * self.d_model)
            self._pe_row_cache[key] = row
        return row

    def __call__(self, x: jnp.ndarray, *, force_pallas: bool = False) -> jnp.ndarray:
        S, S2, D = x.shape
        assert S2 == S, "forward uses x.size(0) for both the pe slice and the repeat"
        assert S <= self.max_len, f"sequence length {S} exceeds registered max_len {self.max_len}"
        assert D == self.d_model, "d_model mismatch between x and pe"
        # Note: PyTorch would promote bf16 x + f32 pe buffer to an f32 result; here the
        # output stays in x.dtype (exact match for the f32 case used by this module).

        itemsize = jnp.dtype(x.dtype).itemsize
        if not force_pallas and x.size * itemsize < self._FAST_PATH_BYTES:
            # Tiny inputs: fused XLA broadcast-add is strictly faster than a kernel launch.
            return x + self.pe[:S].astype(x.dtype)[None, :, :]

        N = S * D
        x2 = x.reshape(S, N)                          # free, contiguous lane-dense view
        pe_row = self._pe_row(S, x.dtype)             # (1, N), cached per (S, dtype)

        TM, TN = _choose_tiles(S, N, itemsize)
        grid = (pl.cdiv(S, TM), pl.cdiv(N, TN))

        # 2x double-buffered x tiles + 2x out tiles + resident pe block (+25% / 2 MiB slack).
        # At the 4 MiB tile target this lands at 32 MiB: above v5e's 16 MiB default scoped
        # VMEM (hence explicit), comfortably below v7x's 64 MiB physical per-TC VMEM.
        tile_bytes = TM * TN * itemsize
        need = 4 * tile_bytes + 2 * 8 * TN * itemsize
        vmem_limit = int(min(max(need + need // 4 + (2 << 20), 32 << 20), 56 << 20))

        out2 = pl.pallas_call(
            _latlon_add_kernel,
            out_shape=jax.ShapeDtypeStruct((S, N), x.dtype),
            grid_spec=pltpu.PrefetchScalarGridSpec(
                num_scalar_prefetch=0,
                grid=grid,
                in_specs=[
                    pl.BlockSpec((TM, TN), lambda i, j: (i, j)),   # x tile
                    pl.BlockSpec((1, TN), lambda i, j: (0, j)),    # pe row slice (resident)
                ],
                out_specs=pl.BlockSpec((TM, TN), lambda i, j: (i, j)),
            ),
            input_output_aliases={0: 0},   # write the result into x2's buffer when donated
            compiler_params=pltpu.CompilerParams(
                dimension_semantics=("parallel", "parallel"),
                vmem_limit_bytes=vmem_limit,
            ),
        )(x2, pe_row)

        return out2.reshape(S, S, D)


if __name__ == "__main__":
    S = 16       # sequence / grid extent (forward uses it for both leading axes)
    D = 32       # d_model
    MAX_LEN = 1000

    key = jax.random.PRNGKey(0)
    x = jax.random.normal(key, (S, S, D), dtype=jnp.float32)

    module = LatLonEncoding(D, MAX_LEN)

    # Reference (pure JAX) of the PyTorch semantics, computed BEFORE the kernel call so
    # output aliasing can never perturb the check.
    ref = x + jnp.broadcast_to(module.pe[:S, :][None, :, :], (S, S, D))

    # Exercise the Pallas kernel (this small demo shape would otherwise hit the fast path),
    # then also check the default dispatch path.
    out = module(x, force_pallas=True)
    out = jax.block_until_ready(out)
    out_fast = jax.block_until_ready(module(x))

    assert out.shape == (S, S, D) and out.dtype == jnp.float32
    assert jnp.allclose(out, ref, atol=1e-6, rtol=1e-6)
    assert jnp.allclose(out_fast, ref, atol=1e-6, rtol=1e-6)

    print("KERNEL_OK")
</pallas_src>

<mosaic_0001>
module attributes {stable_mosaic.version = 11 : i64} {
  func.func @_latlon_add_kernel(%arg0: i32, %arg1: i32, %arg2: memref<8x512xf32, #tpu.memory_space<vmem>>, %arg3: memref<1x512xf32, #tpu.memory_space<vmem>>, %arg4: memref<8x512xf32, #tpu.memory_space<vmem>>) attributes {dimension_semantics = [#tpu.dimension_semantics<parallel>, #tpu.dimension_semantics<parallel>], iteration_bounds = array<i64: 2, 1>, scalar_prefetch = 0 : i64, scratch_operands = 0 : i64, tpu.core_type = #tpu.core_type<tc>, window_params = [{transform_indices = @transform_0, window_bounds = array<i64: 8, 512>}, {transform_indices = @transform_1, window_bounds = array<i64: 1, 512>}, {transform_indices = @transform_2, window_bounds = array<i64: 8, 512>}]} {
    %c0 = arith.constant 0 : index
    %c0_0 = arith.constant 0 : index
    %0 = vector.load %arg2[%c0, %c0_0] : memref<8x512xf32, #tpu.memory_space<vmem>>, vector<8x512xf32>
    %c0_1 = arith.constant 0 : index
    %c0_2 = arith.constant 0 : index
    %1 = vector.load %arg3[%c0_1, %c0_2] : memref<1x512xf32, #tpu.memory_space<vmem>>, vector<1x512xf32>
    %2 = vector.broadcast %1 : vector<1x512xf32> to vector<8x512xf32>
    %3 = arith.addf %0, %2 : vector<8x512xf32>
    %c0_3 = arith.constant 0 : index
    %c0_4 = arith.constant 0 : index
    %4 = vector.load %arg4[%c0_3, %c0_4] : memref<8x512xf32, #tpu.memory_space<vmem>>, vector<8x512xf32>
    tpu.vector_store %arg4[%c0_3, %c0_4], %3 {strides = array<i32>} : memref<8x512xf32, #tpu.memory_space<vmem>>, vector<8x512xf32>,
    return
  }
  func.func @transform_0(%arg0: i32, %arg1: i32) -> (i32, i32) {
    %c0_i32 = arith.constant 0 : i32
    return %arg0, %arg1 : i32, i32
  }
  func.func @transform_1(%arg0: i32, %arg1: i32) -> (i32, i32) {
    %c0_i32 = arith.constant 0 : i32
    %c0_i32_0 = arith.constant 0 : i32
    return %c0_i32, %arg1 : i32, i32
  }
  func.func @transform_2(%arg0: i32, %arg1: i32) -> (i32, i32) {
    %c0_i32 = arith.constant 0 : i32
    return %arg0, %arg1 : i32, i32
  }
}

</mosaic_0001>

<bundles_post_ra>
// kernel: tpu_custom_call.1
= control target key start
LH: loop header
LB: loop body
LE: loop exit
PB: predicated region body
PF: predicated region fallthrough
CT: control target
= control target key end

     0   :  { %7 = vsyncpa [#allocation3], 0  ;;  %s670_s0 = inlined_call_operand.hbm [shape: f32[16,512], index: 0, kind: input, shape index: {}, may-alias: {0,2}]   ;;  %s671_s1 = inlined_call_operand.vmem [shape: f32[1,512], index: 1, kind: input, shape index: {}]   ;;  %s672_s2 = inlined_call_operand.hbm [shape: f32[16,512], index: 2, kind: output, shape index: {}, may-alias: {0,2}]  }
   0x1   :  { %9 = vsyncpa [#allocation3 + $0x1], 0 }
   0x2   :  { %10 = vsyncpa [#allocation4], 0 }
   0x3   :  { %12 = vsyncpa [#allocation4 + $0x1], 0  ;;  %s547_s9 = smov 0   ;;  %s549_s10 = smov 0  }
   0x4   :  { %s551_s11 = smov 0   ;;  %s553_s12 = smov 0  }
   0x5   :  { %s555_s13 = smov 0   ;;  %s557_s14 = smov 0  }
   0x6 LB: > { %s338_s15 = sadd.s32 4294967295, %s530_s14   ;;  %s339_s16 = sadd.s32 4294967294, %s530_s14   ;;  %s530_s14 = sphi %s557_s14, %s18_s14   ;;  %s526_s13 = sphi %s555_s13, %s681_s13   ;;  %s522_s12 = sphi %s553_s12, %s680_s12   ;;  %s518_s11 = sphi %s551_s11, %s679_s11   ;;  %s514_s10 = sphi %s549_s10, %s678_s10   ;;  %s510_s9 = sphi %s547_s9, %s677_s9  }
   0x7   : > { %s30_s17 = sadd.s32 1, %s526_s13  ;;  %s39_s18 = sadd.s32 1, %s518_s11 }
   0x8   : > { %p32_p0 = scmp.ge.s32.totalorder %s30_s17, 2  ;;  %p46_p1 = scmp.ne.s32.totalorder %s518_s11, %s514_s10 }
   0x9   : > { %p47_p2 = scmp.eq.s32.totalorder %s530_s14, 0  ;;  %p52_p3 = scmp.ne.s32.totalorder %s514_s10, %s510_s9 }
   0xa   : > { %s683_s17 = smov (%p32_p0, %s30_s17), 0  ;;  %p53_p5 = scmp.eq.s32.totalorder %s338_s15, 0 }
   0xb   : > { %p588_p4 = por %p47_p2, %p46_p1  ;;  %s34_s20 = ssub.s32 %s526_s13, %s683_s17 }
   0xc   : > { %p104_p6 = scmp.eq.s32.totalorder %s338_s15, 1  ;;  %p37_p7 = scmp.eq.s32.totalorder %s34_s20, 0 }
   0xd   : > { %p594_p8 = por %p53_p5, %p52_p3  ;;  %p110_p10 = scmp.eq.s32.totalorder %s339_s16, 1 }
   0xe   : > { %p598_p9 = por %p104_p6, %p46_p1  ;;  %p342_p12 = scmp.ge.s32.totalorder %s530_s14, 2 }
   0xf   : > { %s603_s23 = scalar_select %p37_p7, %s518_s11, %s39_s18  }
  0x10   : > { %p605_p11 = por %p110_p10, %p52_p3  ;;  %p368_p13 = scmp.lt.s32.totalorder %s530_s14, 2 }
  0x11   : > { %s138_s25 = sand.u32 1, %s518_s11   ;;  %s354_s27 = sshll.u32 %s526_s13, 5 }
  0x12   : > { %s343_s26 = sshll.u32 %s138_s25, 5  ;;  %s149_s30 = scalar_lea.hbm %s670_s0, %s354_s27 }
  0x13   : > { %s142_s3 = scalar_lea.vmem [#allocation2], %s343_s26  ;;  %s151_s5 = sshll.u32 %s149_s30, 4  ;;  %s152_s5 = int_to_ptr.hbm [resolvable:$true] %s151_s5 }
  0x14   : > { %s153_s4 = sshll.u32 %s142_s3, 4  ;;  %p361_p0 = pnand %p368_p13, %p588_p4  ;;  %s154_s4 = int_to_ptr.vmem [resolvable:$true] %s153_s4 }
  0x15   : > { %p346_p1 = scmp.ge.s32.totalorder %s530_s14, 1  ;;  %p158_p2 = scmp.lt.s32.totalorder %s530_s14, 3 }
  0x16   : > { %s139_s6 = scalar_lea.sflag [#allocation3], %s138_s25 }
  0x17   : > { %363 = dma.hbm_to_vmem [thread:$0]  (!%p361_p0), %s152_s5, 512, %s154_s4, %s139_s6  }
  0x18   : > { %p159_p3 = pnand %p346_p1, %p158_p2 }
  0x19   : > { %s621_s7 = sand.u32 (!%p159_p3), 1, %s514_s10  }
  0x1a   : > { %162 = sbr.rel (%p159_p3) target bundleno = 47 (0x2f), region = 28  ;;  %s347_s8 = sshll.u32 (!%p159_p3), %s621_s7, 5 }
  0x1b   : > { %s165_s15 = scalar_lea.sflag (!%p159_p3), [#allocation3], %s621_s7  ;;  %s168_s16 = scalar_lea.vmem (!%p159_p3), [#allocation2], %s347_s8 }
  0x1f   : > { %501 = dma.done.wait (%p594_p8), %s165_s15, 512  }
  0x20   : > { %503 = vsyncadd (%p594_p8), %s165_s15, 4294966784  ;;  %s355_s18 = sshll.u32 %s522_s12, 5  ;;  %v201_v0 = vld [vmem:[%s168_s16] sm:$0xff]  ;;  %v202_v2 = vld [vmem:[%s168_s16 + $0x8] sm:$0xff]  ;;  %s193_s21 = scalar_lea.vmem [#allocation5], %s347_s8 }
  0x21   : > { %v205_v1 = vld [vmem:[%s671_s1] sm:$0xf]  ;;  %s237_s27 = scalar_lea.hbm %s672_s2, %s355_s18  ;;  %v203_v5 = vld [vmem:[%s168_s16 + $0x10] sm:$0xff]  ;;  %v204_v7 = vld [vmem:[%s168_s16 + $0x18] sm:$0xff]  ;;  %s239_s12 = sshll.u32 %s193_s21, 4  ;;  %s240_s12 = int_to_ptr.vmem [resolvable:$true] %s239_s12 }
  0x22   : > { %v207_v3 = vperm.slane %v205_v1, 0  ;;  %v208_v4 = vperm.slane %v205_v1, 1  ;;  %v209_v6 = vperm.slane %v205_v1, 2  ;;  %v210_v8 = vperm.slane %v205_v1, 3  ;;  %s241_s28 = sshll.u32 %s237_s27, 4  ;;  %s224_s29 = scalar_lea.sflag [#allocation4], %s621_s7  ;;  %s242_s28 = int_to_ptr.hbm [resolvable:$true] %s241_s28 }
  0x23   : > { %s462_s30 = sshra.s32 %s242_s28, 4  ;;  %s468_s6 = scalar_lea.hbm %s672_s2, 64  ;;  %s463_s30 = int_to_ptr.hbm [resolvable:$true] %s462_s30 }
  0x24   : > { %v215_v9 = vadd.f32 %v207_v3, %v201_v0  ;;  %v216_v10 = vadd.f32 %v208_v4, %v202_v2  ;;  %v217_v11 = vadd.f32 %v209_v6, %v203_v5  ;;  %v218_v12 = vadd.f32 %v210_v8, %v204_v7  ;;  %s464_s3 = scalar_lea.hbm %s463_s30, 32  ;;  %p469_p7 = scmp.lt.s32.totalorder %s463_s30, %s672_s2 }
  0x25   : > { %p465_p4 = scmp.ne.s32.totalorder %s463_s30, %s464_s3  ;;  %p470_p8 = scmp.lt.s32.totalorder %s468_s6, %s464_s3 }
  0x26   : > { %219 = vst [vmem:[%s193_s21] sm:$0xff] %v215_v9 }
  0x27   : > { %220 = vst [vmem:[%s193_s21 + $0x8] sm:$0xff] %v216_v10  ;;  %p466_p5 = pnand %p465_p4, %p598_p9  ;;  %p471_p10 = por %p470_p8, %p469_p7 }
  0x28   : > { %221 = vst [vmem:[%s193_s21 + $0x10] sm:$0xff] %v217_v11 }
  0x29   : > { %222 = vst [vmem:[%s193_s21 + $0x18] sm:$0xff] %v218_v12  ;;  %p467_p6 = pneg %p466_p5 }
  0x2b   : > { %p472_p13 = pnand %p471_p10, %p467_p6 }
  0x2d   : > { %475 = shalt.err (!%p472_p13)
}
  0x2e   : > { %358 = dma.vmem_to_hbm [thread:$0]  (%p598_p9), %s240_s12, 512, %s242_s28, %s224_s29  }
  0x2f PF: > { %s253_s7 = sand.u32 1, %s510_s9   ;;  %p365_p0 = pnand %p342_p12, %p605_p11 }
  0x30   : > { %s254_s16 = scalar_lea.sflag [#allocation4], %s253_s7 }
  0x31   : > { %p366_p1 = pneg %p365_p0 }
  0x33   : > { %505 = dma.done.wait (%p366_p1), %s254_s16, 512  }
  0x34   : > { %507 = vsyncadd (%p366_p1), %s254_s16, 4294966784  ;;  %s18_s14 = sadd.s32 1, %s530_s14   ;;  %s677_s9 = smov %s514_s10 }
  0x35   : > { %p15_p2 = scmp.ge.s32.totalorder %s18_s14, 4   ;;  %s678_s10 = smov %s518_s11 }
  0x36   : > { %s679_s11 = smov %s603_s23  ;;  %s680_s12 = smov %s526_s13 }
  0x37   : > { %s681_s13 = smov %s683_s17  ;;  %17 = sbr.rel (!%p15_p2) target bundleno = 6 (0x6), region = 76 }
  0x3c   :  { %260 = vsyncpa [#allocation3], 1 }
  0x3d   :  { %262 = vsyncpa [#allocation3 + $0x1], 1 }
  0x3e   :  { %263 = vsyncpa [#allocation4], 1 }
  0x3f   :  { %265 = vsyncpa [#allocation4 + $0x1], 1 }

</bundles_post_ra>
